<compile_context>
chip_gen: v6e
topology: v6e:2x2x1
jax: 0.10.0
libtpu: 0.0.40
codegen_flags: <defaults>
</compile_context>

<pallas_src>
import jax
import jax.numpy as jnp
from jax.experimental import pallas as pl
from jax.experimental.pallas import tpu as pltpu

_K = 4                      # contraction dim of the module's weight
_N = 3                      # output dim of the module's weight
_GROUP = 32                 # x-rows folded per packed row: 32 * 4 = 128 lanes
_PACKED_IN = _GROUP * _K    # 128 (lane-dense input row)
_PACKED_OUT = _GROUP * _N   # 96  (lane-dense output row)


def _cdiv(a: int, b: int) -> int:
    return (a + b - 1) // b


def _round_up(n: int, m: int) -> int:
    return ((n + m - 1) // m) * m


def _vmem_budget_bytes() -> int:
    """Generation-aware VMEM budget: ~48 MiB on v7x, ~96 MiB on v5e/v6e."""
    cap = 64 * 1024 * 1024  # conservative fallback (v7x physical VMEM)
    try:
        cap = int(pltpu.get_tpu_info().vmem_capacity_bytes)
    except Exception:
        pass
    return min((cap * 3) // 4, 96 * 1024 * 1024)


def _matmul_kernel(xp_ref, w_ref, out_ref):
    """One grid step: out2d tile = xp tile @ kron(I_32, a).

    xp_ref : (TB, 128) packed x tile, lane-dense VMEM block.
    w_ref  : (128, 96) f32 block-diagonal weight, resident across the grid.
    out_ref: (TB, 96)  packed output tile, lane-dense VMEM block.
    """
    xv = xp_ref[...].astype(jnp.float32)          # single whole-tile load
    acc = jnp.dot(xv, w_ref[...], preferred_element_type=jnp.float32)
    out_ref[...] = acc.astype(out_ref.dtype)


def partially_used_forward(x, a, *, tile_packed_rows: int = 8192):
    """Pallas TPU `_PartiallyUsed.forward`: returns x @ a.

    x: (..., 4); a: (4, 3); result: (..., 3) with dtype = result_type(x, a).
    `tile_packed_rows` = packed rows (32 x-rows each) per grid step.
    """
    *lead, k = x.shape
    assert k == _K, f"last dim of x must be {_K}, got {k}"
    ka, n = a.shape
    assert (ka, n) == (_K, _N), f"weight must be ({_K},{_N}), got {a.shape}"

    out_dtype = jnp.result_type(x.dtype, a.dtype)

    x2 = x.reshape(-1, _K)
    m = x2.shape[0]

    # Fast path requires M % 32 == 0 (free row-major reshape to (M/32, 128)).
    # Otherwise pad the ragged tail (< 32 zero rows); producers that care
    # should supply M % 32 == 0 so this stays a zero-copy path.
    m_pad = _round_up(max(m, 1), _GROUP)
    if m_pad != m:
        x2 = jnp.pad(x2, ((0, m_pad - m), (0, 0)))
    xp = x2.reshape(m_pad // _GROUP, _PACKED_IN)   # free reshape (row-major)
    p = xp.shape[0]                                # packed rows

    # W = kron(I_32, a): (128, 96).  (xp @ W) reshaped row-major is exactly
    # x @ a.  Built once in the wrapper; resident in VMEM across the grid.
    w = jnp.kron(jnp.eye(_GROUP, dtype=jnp.float32), a.astype(jnp.float32))

    # ---- tile-size selection, clamped against the VMEM budget -------------
    budget = _vmem_budget_bytes()
    x_bytes = jnp.dtype(x.dtype).itemsize
    out_bytes = max(jnp.dtype(out_dtype).itemsize, 4)   # 96 pads to 128 lanes
    # double-buffered input + output blocks; ~1 MiB headroom for the resident
    # weight and in-kernel temporaries.
    per_packed_row = 2 * _PACKED_IN * (x_bytes + out_bytes)
    tb_max = max(8, ((budget - (1 << 20)) // per_packed_row) // 8 * 8)
    tb = max(8, (min(int(tile_packed_rows), tb_max) // 8) * 8)

    steps = _cdiv(p, tb)
    if p >= 16:
        # Even step count >= 2 so "parallel" can shard tiles across the two
        # TensorCores on v7x (neutral on single-TC v5e/v6e).
        steps = max(steps, 2)
        if steps % 2:
            steps += 1
        tb = min(tb, _round_up(_cdiv(p, steps), 8))
        steps = _cdiv(p, tb)
        # Ragged last block (if any) is handled by Pallas: out-of-range input
        # lanes read unspecified data, out-of-range output writes are dropped;
        # results are per-row independent so in-range rows are unaffected.
    else:
        tb = p          # tiny input: single block == full array, no padding
        steps = 1

    grid = (steps,)

    out2d = pl.pallas_call(
        _matmul_kernel,
        out_shape=jax.ShapeDtypeStruct((p, _PACKED_OUT), out_dtype),
        grid=grid,
        in_specs=[
            # packed x streamed in lane-dense (TB, 128) tiles along M.
            # (pipeline_mode=pl.Buffered(3) is a cheap knob if profiling shows
            #  exposed input DMA; left at default to keep v7x VMEM headroom.)
            pl.BlockSpec((tb, _PACKED_IN), lambda i: (i, 0)),
            # expanded weight: whole (128, 96) array, resident across the grid.
            pl.BlockSpec((_PACKED_IN, _PACKED_OUT), lambda i: (0, 0)),
        ],
        out_specs=pl.BlockSpec((tb, _PACKED_OUT), lambda i: (i, 0)),
        compiler_params=pltpu.CompilerParams(
            dimension_semantics=("parallel",),
            vmem_limit_bytes=int(budget),
        ),
    )(xp, w)

    out = out2d.reshape(m_pad, _N)                 # free reshape (row-major)
    if m_pad != m:
        out = out[:m]
    return out.reshape(*lead, _N)


if __name__ == "__main__":
    key = jax.random.PRNGKey(0)
    kx, ka, kb = jax.random.split(key, 3)

    # Parameters mirroring torch.rand(4, 3) (uniform [0, 1)).
    a = jax.random.uniform(ka, (_K, _N), dtype=jnp.float32)
    b = jax.random.uniform(kb, (_K, _N), dtype=jnp.float32)  # unused in forward

    # Small shapes: 32-aligned fast path, a multi-step grid, and a ragged tail.
    for m_rows in (256, 8192, 40):
        x = jax.random.uniform(kx, (m_rows, _K), dtype=jnp.float32)
        out = jax.block_until_ready(partially_used_forward(x, a))
        ref = x @ a
        assert out.shape == (m_rows, _N), out.shape
        assert jnp.allclose(out, ref, atol=1e-5, rtol=1e-5), (
            f"mismatch at M={m_rows}")

    print("KERNEL_OK")
</pallas_src>

<mosaic_0001>
module attributes {stable_mosaic.version = 11 : i64} {
  func.func @_matmul_kernel(%arg0: i32, %arg1: memref<8x128xf32, #tpu.memory_space<vmem>>, %arg2: memref<128x96xf32, #tpu.memory_space<vmem>>, %arg3: memref<8x96xf32, #tpu.memory_space<vmem>>) attributes {dimension_semantics = [#tpu.dimension_semantics<parallel>], iteration_bounds = array<i64: 1>, scalar_prefetch = 0 : i64, scratch_operands = 0 : i64, tpu.core_type = #tpu.core_type<tc>, window_params = [{transform_indices = @transform_0, window_bounds = array<i64: 8, 128>}, {pipeline_mode = #tpu.pipeline_mode<synchronous>, transform_indices = @transform_1, window_bounds = array<i64: 128, 96>}, {transform_indices = @transform_2, window_bounds = array<i64: 8, 96>}]} {
    %c0 = arith.constant 0 : index
    %c0_0 = arith.constant 0 : index
    %0 = vector.load %arg1[%c0, %c0_0] : memref<8x128xf32, #tpu.memory_space<vmem>>, vector<8x128xf32>
    %c0_1 = arith.constant 0 : index
    %c0_2 = arith.constant 0 : index
    %1 = vector.load %arg2[%c0_1, %c0_2] : memref<128x96xf32, #tpu.memory_space<vmem>>, vector<128x96xf32>
    %cst = arith.constant dense<0.000000e+00> : vector<8x96xf32>
    %2 = tpu.matmul %0, %1, %cst {dimension_numbers = #tpu.dot_dimension_numbers<[1], [0], [0], [1], [0, 0, 1, 1], [], []>} : vector<8x128xf32>, vector<128x96xf32>, vector<8x96xf32> -> vector<8x96xf32>
    %c0_3 = arith.constant 0 : index
    %c0_4 = arith.constant 0 : index
    %3 = vector.load %arg3[%c0_3, %c0_4] : memref<8x96xf32, #tpu.memory_space<vmem>>, vector<8x96xf32>
    tpu.vector_store %arg3[%c0_3, %c0_4], %2 {strides = array<i32>} : memref<8x96xf32, #tpu.memory_space<vmem>>, vector<8x96xf32>,
    return
  }
  func.func @transform_0(%arg0: i32) -> (i32, i32) {
    %c0_i32 = arith.constant 0 : i32
    %c0_i32_0 = arith.constant 0 : i32
    return %arg0, %c0_i32 : i32, i32
  }
  func.func @transform_1(%arg0: i32) -> (i32, i32) {
    %c0_i32 = arith.constant 0 : i32
    %c0_i32_0 = arith.constant 0 : i32
    %c0_i32_1 = arith.constant 0 : i32
    return %c0_i32, %c0_i32_0 : i32, i32
  }
  func.func @transform_2(%arg0: i32) -> (i32, i32) {
    %c0_i32 = arith.constant 0 : i32
    %c0_i32_0 = arith.constant 0 : i32
    return %arg0, %c0_i32 : i32, i32
  }
}

</mosaic_0001>

<bundles_post_ra>
// kernel: tpu_custom_call.1
= control target key start
LH: loop header
LB: loop body
LE: loop exit
PB: predicated region body
PF: predicated region fallthrough
CT: control target
= control target key end

     0   :  { %v192_v1 = vmov 0.0   ;;  %vm193_vm0 = vmmov 0   ;;  %s264_s0 = inlined_call_operand.vmem [shape: f32[8,128], index: 0, kind: input, shape index: {}]   ;;  %s265_s1 = inlined_call_operand.vmem [shape: f32[128,96], index: 1, kind: input, shape index: {}]   ;;  %s266_s2 = inlined_call_operand.hbm [shape: f32[8,96], index: 2, kind: output, shape index: {}]  }
   0x1   :  { %v28_v0 = vld [vmem:[%s265_s1 + $0x78] sm:$0xff]  ;;  %132 = vmatprep.subr.mxu0 %v192_v1  ;;  %v27_v2 = vld [vmem:[%s265_s1 + $0x70] sm:$0xff]  ;;  %164 = vmatprep.mubr.msk.f32.mxu0 %vm193_vm0, %v192_v1  ;;  %v26_v3 = vld [vmem:[%s265_s1 + $0x68] sm:$0xff] }
   0x2   :  { %133 = vmatpush3.msra.mxu0 %v28_v0  ;;  %v25_v4 = vld [vmem:[%s265_s1 + $0x60] sm:$0xff] }
   0x3   :  { %134 = vmatprep.subr.mxu0 %v192_v1 }
   0x4   :  { %135 = vmatpush3.msra.mxu0 %v27_v2 }
   0x5   :  { %136 = vmatprep.subr.mxu0 %v192_v1 }
   0x6   :  { %7 = vsyncpa [#allocation3], 0  ;;  %137 = vmatpush3.msra.mxu0 %v26_v3  ;;  %v24_v5 = vld [vmem:[%s265_s1 + $0x58] sm:$0xff]  ;;  %v23_v6 = vld [vmem:[%s265_s1 + $0x50] sm:$0xff]  ;;  %s194_s15 = smov [#allocation2]   ;;  %vm99_vm1 = vcmask 785408  }
   0x7   :  { %138 = vmatprep.subr.mxu0 %v192_v1  ;;  %v22_v7 = vld [vmem:[%s265_s1 + $0x48] sm:$0xff]  ;;  %v21_v8 = vld [vmem:[%s265_s1 + $0x40] sm:$0xff]  ;;  %v20_v9 = vld [vmem:[%s265_s1 + $0x38] sm:$0xff]  ;;  %s107_s16 = sshll.u32 %s194_s15, 4  ;;  %s108_s16 = int_to_ptr.vmem [resolvable:$true] %s107_s16 }
   0x8   :  { %139 = vmatpush3.msra.mxu0 %v25_v4  ;;  %v19_v10 = vld [vmem:[%s265_s1 + $0x30] sm:$0xff]  ;;  %v18_v11 = vld [vmem:[%s265_s1 + $0x28] sm:$0xff]  ;;  %v17_v12 = vld [vmem:[%s265_s1 + $0x20] sm:$0xff]  ;;  %s170_s17 = scalar_lea.vmem %s108_s16, 128  ;;  %p175_p1 = scmp.lt.s32.totalorder %s108_s16, %s108_s16 }
   0x9   :  { %140 = vmatprep.subr.mxu0 %v192_v1  ;;  %v16_v13 = vld [vmem:[%s265_s1 + $0x18] sm:$0xff]  ;;  %v15_v14 = vld [vmem:[%s265_s1 + $0x10] sm:$0xff]  ;;  %v14_v15 = vld [vmem:[%s265_s1 + $0x8] sm:$0xff]  ;;  %p171_p0 = scmp.ne.s32.totalorder %s108_s16, %s170_s17  ;;  %p176_p2 = scmp.lt.s32.totalorder %s170_s17, %s170_s17 }
   0xa   :  { %141 = vmatpush3.msra.mxu0 %v24_v5  ;;  %v13_v16 = vld [vmem:[%s265_s1] sm:$0xff] }
   0xb   :  { %142 = vmatprep.subr.mxu0 %v192_v1  ;;  %v12_v17 = vld [vmem:[%s264_s0] sm:$0xff]  ;;  %p177_p3 = por %p176_p2, %p175_p1 }
   0xc   :  { %143 = vmatpush3.msra.mxu0 %v23_v6 }
   0xd   :  { %144 = vmatprep.subr.mxu0 %v192_v1  ;;  %p178_p4 = pnand %p177_p3, %p171_p0 }
   0xe   :  { %145 = vmatpush3.msra.mxu0 %v22_v7 }
   0xf   :  { %146 = vmatprep.subr.mxu0 %v192_v1 }
  0x10   :  { %147 = vmatpush3.msra.mxu0 %v21_v8 }
  0x11   :  { %148 = vmatprep.subr.mxu0 %v192_v1 }
  0x12   :  { %149 = vmatpush3.msra.mxu0 %v20_v9 }
  0x13   :  { %150 = vmatprep.subr.mxu0 %v192_v1 }
  0x14   :  { %151 = vmatpush3.msra.mxu0 %v19_v10 }
  0x15   :  { %152 = vmatprep.subr.mxu0 %v192_v1 }
  0x16   :  { %153 = vmatpush3.msra.mxu0 %v18_v11 }
  0x17   :  { %154 = vmatprep.subr.mxu0 %v192_v1 }
  0x18   :  { %155 = vmatpush3.msra.mxu0 %v17_v12 }
  0x19   :  { %156 = vmatprep.subr.mxu0 %v192_v1 }
  0x1a   :  { %157 = vmatpush3.msra.mxu0 %v16_v13 }
  0x1b   :  { %158 = vmatprep.subr.mxu0 %v192_v1 }
  0x1c   :  { %159 = vmatpush3.msra.mxu0 %v15_v14 }
  0x1d   :  { %160 = vmatprep.subr.mxu0 %v192_v1 }
  0x1e   :  { %161 = vmatpush3.msra.mxu0 %v14_v15 }
  0x1f   :  { %162 = vmatprep.subr.mxu0 %v192_v1 }
  0x20   :  { %163 = vmatpush3.msra.mxu0 %v13_v16 }
  0x21   :  { %165 = vmatmul.mubr.f32.vlgmr.msra.gmra.mxu0 %v12_v17 }
  0xe1   :  { %v95_v18 = vpop.f32.mrf.mxu0 }
  0xe2   :  { %100 = vst.msk [vmem:[#allocation2] sm:$0xff] %vm99_vm1, %v95_v18 }
  0xe3   :  { %v166_v19 = vpop.f32.mrf.mxu0 }
  0xe4   :  { %181 = shalt.err (!%p178_p4)
}
  0xe5   :  { %110 = dma.vmem_to_hbm [thread:$0]  %s108_s16, 128, %s266_s2, [#allocation3]  }
  0xe6   :  { %190 = dma.done.wait [#allocation3], 128  }
  0xe7   :  { %191 = vsyncadd [#allocation3], 4294967168 }
  0xe8   :  { %114 = vsyncpa [#allocation3], 1 }

</bundles_post_ra>
